<compile_context>
chip_gen: v5e
topology: v5e:2x2
jax: 0.10.0
libtpu: 0.0.40
codegen_flags: <defaults>
</compile_context>

<pallas_src>
import math
from functools import lru_cache

import numpy as np
import jax
import jax.numpy as jnp
from jax.experimental import pallas as pl
from jax.experimental.pallas import tpu as pltpu

_GCONST_ = -0.9189385332046727   # -log(sqrt(2*pi)), as in CFLOW-AD get_logp
_CLAMP = 1.9                     # soft clamp on coupling scale


# ----------------------------------------------------------------------------
# Pallas kernels
# ----------------------------------------------------------------------------
def _conv_relu_pool_kernel(p00_ref, p01_ref, p10_ref, p11_ref, w_ref, b_ref,
                           act_ref, actT_ref):
    """im2col conv + bias + ReLU + fused 2x2 average pool.

    p??_ref : (TM, 9*Cin)  patch rows for each of the 4 positions of the pool
                           quad, rows in pooled (b, ph, pw) order
    w_ref   : (9*Cin, Cout)
    b_ref   : (1, Cout)
    act_ref : (TM, Cout)   pooled activation rows
    actT_ref: (Cout, TM)   transposed pooled activation (lane-dense), consumed
                           directly by the flow kernel
    """
    w = w_ref[...]
    b = b_ref[...]
    acc = jnp.maximum(
        jnp.dot(p00_ref[...], w, preferred_element_type=jnp.float32) + b, 0.0)
    acc = acc + jnp.maximum(
        jnp.dot(p01_ref[...], w, preferred_element_type=jnp.float32) + b, 0.0)
    acc = acc + jnp.maximum(
        jnp.dot(p10_ref[...], w, preferred_element_type=jnp.float32) + b, 0.0)
    acc = acc + jnp.maximum(
        jnp.dot(p11_ref[...], w, preferred_element_type=jnp.float32) + b, 0.0)
    yp = acc * 0.25
    act_ref[...] = yp
    actT_ref[...] = yp.T


def _flow_logp_kernel(e_ref, c_ref, w1a_ref, w1c_ref, b1_ref, w2_ref, b2_ref,
                      out_ref):
    """Conditional affine-coupling flow + get_logp, transposed (rows on lanes).

    e_ref  : (C, T)               activation columns for T decoder rows
    c_ref  : (P, T)               positional condition columns
    w1a_ref: (K, hidden, C/2)     first-layer weights on z-half (transposed)
    w1c_ref: (K*hidden, P)        first-layer weights on the condition, stacked
    b1_ref : (K, hidden, 1)
    w2_ref : (K, C, hidden)       packed [w2s; w2t]^T per coupling step
    b2_ref : (K, C, 1)
    out_ref: (1, T)               lane-dense log_prob row
    """
    K, hidden, Ch = w1a_ref.shape
    C = 2 * Ch
    inv_clamp = 1.0 / _CLAMP
    inv_C = 1.0 / C

    e = e_ref[...]                              # (C, T)
    z1 = e[:Ch, :]
    z2 = e[Ch:, :]
    T = e.shape[1]

    # Condition contribution for ALL coupling steps in one matmul (hoisted out
    # of the K loop; removes the per-step concatenate copies).
    cond_h = jnp.dot(w1c_ref[...], c_ref[...],
                     preferred_element_type=jnp.float32)   # (K*hidden, T)

    log_jac = jnp.zeros((1, T), jnp.float32)
    for k in range(K):                          # static, small loop (unrolled)
        za, zb = (z1, z2) if k % 2 == 0 else (z2, z1)
        h = jnp.maximum(
            jnp.dot(w1a_ref[k], za, preferred_element_type=jnp.float32)
            + cond_h[k * hidden:(k + 1) * hidden, :] + b1_ref[k], 0.0)
        st = (jnp.dot(w2_ref[k], h, preferred_element_type=jnp.float32)
              + b2_ref[k])                      # (2*Ch, T)
        s = _CLAMP * jnp.tanh(st[:Ch, :] * inv_clamp)
        t = st[Ch:, :]
        zb = zb * jnp.exp(s) + t
        log_jac = log_jac + jnp.sum(s, axis=0, keepdims=True)   # (1, T)
        if k % 2 == 0:
            z2 = zb
        else:
            z1 = zb

    sq = (jnp.sum(z1 * z1, axis=0, keepdims=True)
          + jnp.sum(z2 * z2, axis=0, keepdims=True))             # (1, T)
    logp = C * _GCONST_ - 0.5 * sq + log_jac                     # get_logp
    out_ref[...] = logp * inv_C                                  # log_prob


# ----------------------------------------------------------------------------
# Pallas wrappers
# ----------------------------------------------------------------------------
def _row_tile(n, lane=False):
    """128-sized tiles when legal (pipelining + megacore), else full extent."""
    if n > 128 and n % 128 == 0:
        return 128
    return n


def conv3x3_relu_pool(x_nhwc, w_mat, b_row):
    """3x3 'same' conv + bias + ReLU + 2x2 avg-pool.

    im2col is cheap XLA glue; matmuls + ReLU + pool + transpose run in Pallas.
    Returns (pooled NHWC activation, transposed (Cout, Ep) activation).
    """
    B, H, W, Cin = x_nhwc.shape
    Hp, Wp = H // 2, W // 2
    Ep = B * Hp * Wp
    Kd = w_mat.shape[0]            # 9 * Cin
    Cout = w_mat.shape[1]

    xp = jnp.pad(x_nhwc, ((0, 0), (1, 1), (1, 1), (0, 0)))
    cols = [xp[:, dh:dh + H, dw:dw + W, :] for dh in range(3) for dw in range(3)]
    patches = jnp.concatenate(cols, axis=-1)                 # (B, H, W, 9*Cin)
    pq = patches.reshape(B, Hp, 2, Wp, 2, Kd)
    # Four quad-position patch blocks, each (Ep, 9*Cin), rows in (b,ph,pw) order.
    p00 = pq[:, :, 0, :, 0, :].reshape(Ep, Kd)
    p01 = pq[:, :, 0, :, 1, :].reshape(Ep, Kd)
    p10 = pq[:, :, 1, :, 0, :].reshape(Ep, Kd)
    p11 = pq[:, :, 1, :, 1, :].reshape(Ep, Kd)

    TM = _row_tile(Ep)
    n_tiles = Ep // TM

    act, actT = pl.pallas_call(
        _conv_relu_pool_kernel,
        out_shape=(jax.ShapeDtypeStruct((Ep, Cout), jnp.float32),
                   jax.ShapeDtypeStruct((Cout, Ep), jnp.float32)),
        grid_spec=pltpu.PrefetchScalarGridSpec(
            num_scalar_prefetch=0,
            grid=(n_tiles,),
            in_specs=[pl.BlockSpec((TM, Kd), lambda i: (i, 0)),
                      pl.BlockSpec((TM, Kd), lambda i: (i, 0)),
                      pl.BlockSpec((TM, Kd), lambda i: (i, 0)),
                      pl.BlockSpec((TM, Kd), lambda i: (i, 0)),
                      pl.BlockSpec((Kd, Cout), lambda i: (0, 0)),
                      pl.BlockSpec((1, Cout), lambda i: (0, 0))],
            out_specs=(pl.BlockSpec((TM, Cout), lambda i: (i, 0)),
                       pl.BlockSpec((Cout, TM), lambda i: (0, i)))),
        compiler_params=pltpu.CompilerParams(dimension_semantics=("parallel",)),
    )(p00, p01, p10, p11, w_mat, b_row)
    return act.reshape(B, Hp, Wp, Cout), actT


def flow_log_prob(e_t, c_t, fp):
    """Per-row log_prob for one pool layer, via the Pallas flow kernel.

    e_t: (C, E) transposed activation (from the conv kernel), c_t: (P, E).
    """
    C, E = e_t.shape
    P = c_t.shape[0]
    pk = fp["packed"]

    T = _row_tile(E)
    n_tiles = E // T

    out = pl.pallas_call(
        _flow_logp_kernel,
        out_shape=jax.ShapeDtypeStruct((1, E), jnp.float32),
        grid_spec=pltpu.PrefetchScalarGridSpec(
            num_scalar_prefetch=0,
            grid=(n_tiles,),
            in_specs=[
                pl.BlockSpec((C, T), lambda i: (0, i)),
                pl.BlockSpec((P, T), lambda i: (0, i)),
                pl.BlockSpec(pk["w1aT"].shape, lambda i: (0, 0, 0)),
                pl.BlockSpec(pk["w1cT"].shape, lambda i: (0, 0)),
                pl.BlockSpec(pk["b1T"].shape, lambda i: (0, 0, 0)),
                pl.BlockSpec(pk["w2T"].shape, lambda i: (0, 0, 0)),
                pl.BlockSpec(pk["b2T"].shape, lambda i: (0, 0, 0)),
            ],
            out_specs=pl.BlockSpec((1, T), lambda i: (0, i))),
        compiler_params=pltpu.CompilerParams(dimension_semantics=("parallel",)),
    )(e_t, c_t, pk["w1aT"], pk["w1cT"], pk["b1T"], pk["w2T"], pk["b2T"])
    return out.reshape(E)


# ----------------------------------------------------------------------------
# Pure-JAX references (independent of the Pallas im2col construction)
# ----------------------------------------------------------------------------
def _conv3x3_relu_pool_ref(x_nhwc, w_mat, b_row):
    B, H, W, Cin = x_nhwc.shape
    Cout = w_mat.shape[1]
    w = w_mat.reshape(3, 3, Cin, Cout)                     # HWIO
    y = jax.lax.conv_general_dilated(
        x_nhwc, w, window_strides=(1, 1), padding=((1, 1), (1, 1)),
        dimension_numbers=("NHWC", "HWIO", "NHWC"),
        precision=jax.lax.Precision.HIGHEST)
    y = jnp.maximum(y + b_row.reshape(1, 1, 1, Cout), 0.0)
    Hp, Wp = H // 2, W // 2
    yp = y.reshape(B, Hp, 2, Wp, 2, Cout).mean(axis=(2, 4))
    return yp, yp.reshape(B * Hp * Wp, Cout).T


def _flow_log_prob_ref(e_t, c_t, fp):
    e_r, c_r = e_t.T, c_t.T
    E, C = e_r.shape
    Ch = C // 2
    z1, z2 = e_r[:, :Ch], e_r[:, Ch:]
    log_jac = jnp.zeros((E, 1), jnp.float32)
    K = fp["w1a"].shape[0]
    for k in range(K):
        za, zb = (z1, z2) if k % 2 == 0 else (z2, z1)
        h = jnp.maximum(za @ fp["w1a"][k] + c_r @ fp["w1c"][k] + fp["b1"][k], 0.0)
        s = _CLAMP * jnp.tanh((h @ fp["w2s"][k] + fp["b2s"][k]) / _CLAMP)
        t = h @ fp["w2t"][k] + fp["b2t"][k]
        zb = zb * jnp.exp(s) + t
        log_jac = log_jac + jnp.sum(s, axis=1, keepdims=True)
        if k % 2 == 0:
            z2 = zb
        else:
            z1 = zb
    sq = (jnp.sum(z1 * z1, axis=1, keepdims=True)
          + jnp.sum(z2 * z2, axis=1, keepdims=True))
    return ((C * _GCONST_ - 0.5 * sq + log_jac) / C)[:, 0]


# ----------------------------------------------------------------------------
# Glue: positional encoding, parameters, CFlow forward
# ----------------------------------------------------------------------------
def positionalencoding2d(D, H, W):
    """Same math as CFLOW-AD positionalencoding2d; returns numpy (D, H, W)."""
    assert D % 4 == 0
    pe = np.zeros((D, H, W), dtype=np.float32)
    d = D // 2
    div_term = np.exp(np.arange(0.0, d, 2) * -(math.log(1e4) / d))
    pos_w = np.arange(0.0, W)[:, None]
    pos_h = np.arange(0.0, H)[:, None]
    pe[0:d:2, :, :] = np.repeat(np.sin(pos_w * div_term).T[:, None, :], H, axis=1)
    pe[1:d:2, :, :] = np.repeat(np.cos(pos_w * div_term).T[:, None, :], H, axis=1)
    pe[d::2, :, :] = np.repeat(np.sin(pos_h * div_term).T[:, :, None], W, axis=2)
    pe[d + 1::2, :, :] = np.repeat(np.cos(pos_h * div_term).T[:, :, None], W, axis=2)
    return pe


@lru_cache(maxsize=None)
def _cond_rows_T(P, H, W, B):
    """Cached HOST numpy (P, E) positional condition, columns in (b,h,w) order."""
    pe = positionalencoding2d(P, H, W).reshape(P, H * W).astype(np.float32)
    return np.tile(pe, (1, B))


def _pack_flow(fp):
    """Init-time packing for the fused / transposed flow kernel."""
    K, Ch, hidden = fp["w1a"].shape
    P = fp["w1c"].shape[1]
    w2 = jnp.concatenate([fp["w2s"], fp["w2t"]], axis=2)       # (K, hidden, 2*Ch)
    b2 = jnp.concatenate([fp["b2s"], fp["b2t"]], axis=2)       # (K, 1, 2*Ch)
    return {
        "w1aT": jnp.transpose(fp["w1a"], (0, 2, 1)),           # (K, hidden, Ch)
        "w1cT": jnp.transpose(fp["w1c"], (0, 2, 1)).reshape(K * hidden, P),
        "b1T":  jnp.transpose(fp["b1"], (0, 2, 1)),            # (K, hidden, 1)
        "w2T":  jnp.transpose(w2, (0, 2, 1)),                  # (K, 2*Ch, hidden)
        "b2T":  jnp.transpose(b2, (0, 2, 1)),                  # (K, 2*Ch, 1)
    }


def init_params(key, Cin=3, C1=16, C2=32, P=16, K=4, hidden=64):
    ks = jax.random.split(key, 32)
    params = {"P": P}
    params["enc_w1"] = 0.2 * jax.random.normal(ks[0], (9 * Cin, C1), jnp.float32)
    params["enc_b1"] = 0.05 * jax.random.normal(ks[1], (1, C1), jnp.float32)
    params["enc_w2"] = 0.1 * jax.random.normal(ks[2], (9 * C1, C2), jnp.float32)
    params["enc_b2"] = 0.05 * jax.random.normal(ks[3], (1, C2), jnp.float32)
    flows = []
    for li, C in enumerate([C1, C2]):
        Ch = C // 2
        b = 4 + li * 7
        fp = {
            "w1a": 0.10 * jax.random.normal(ks[b + 0], (K, Ch, hidden), jnp.float32),
            "w1c": 0.10 * jax.random.normal(ks[b + 1], (K, P, hidden), jnp.float32),
            "b1":  0.02 * jax.random.normal(ks[b + 2], (K, 1, hidden), jnp.float32),
            "w2s": 0.02 * jax.random.normal(ks[b + 3], (K, hidden, Ch), jnp.float32),
            "w2t": 0.02 * jax.random.normal(ks[b + 4], (K, hidden, Ch), jnp.float32),
            "b2s": 0.01 * jax.random.normal(ks[b + 5], (K, 1, Ch), jnp.float32),
            "b2t": 0.01 * jax.random.normal(ks[b + 6], (K, 1, Ch), jnp.float32),
        }
        fp["packed"] = _pack_flow(fp)
        flows.append(fp)
    params["flows"] = flows
    return params


def cflow_forward(params, enc_input_nchw,
                  conv_fn=conv3x3_relu_pool, flow_fn=flow_log_prob):
    """Equivalent of Decoder.forward: returns (height, width, test_dist)."""
    x = jnp.transpose(enc_input_nchw, (0, 2, 3, 1)).astype(jnp.float32)  # -> NHWC
    # Encoder: the pooled stage outputs play the role of the hooked activations.
    a1, a1T = conv_fn(x, params["enc_w1"], params["enc_b1"])    # (B,16,16,16)/(16,E1)
    a2, a2T = conv_fn(a1, params["enc_w2"], params["enc_b2"])   # (B, 8, 8,32)/(32,E2)
    activations = [(a1, a1T), (a2, a2T)]

    P = params["P"]
    height, width, test_dist = [], [], []
    for l, (a, aT) in enumerate(activations):
        B, H, W, C = a.shape
        height.append(H)                   # `i` is always 0 in the torch code
        width.append(W)
        c_t = jnp.asarray(_cond_rows_T(P, H, W, B))             # (P, E)
        log_prob = flow_fn(aT, c_t, params["flows"][l])         # (E,)
        # TODO(synk): torch also accumulates test_loss/test_count from
        # -log_sigmoid(log_prob) but never returns them; skipped here to avoid
        # a per-layer device->host sync.
        test_dist.append(log_prob)
    return height, width, test_dist


# ----------------------------------------------------------------------------
if __name__ == "__main__":
    key = jax.random.PRNGKey(0)
    pkey, xkey = jax.random.split(key)
    params = init_params(pkey)
    enc_input = jax.random.normal(xkey, (2, 3, 32, 32), jnp.float32)  # NCHW

    h, w, dist = cflow_forward(params, enc_input)
    dist = [jax.block_until_ready(d) for d in dist]

    # Cross-check against an independent pure-JAX reference of the same math.
    with jax.default_matmul_precision("float32"):
        h_r, w_r, dist_r = cflow_forward(params, enc_input,
                                         conv_fn=_conv3x3_relu_pool_ref,
                                         flow_fn=_flow_log_prob_ref)
        dist_r = [jax.block_until_ready(d) for d in dist_r]

    ok = (h == h_r) and (w == w_r)
    for d, dr in zip(dist, dist_r):
        ok = ok and bool(jnp.allclose(d, dr, atol=5e-3, rtol=5e-3))
    assert ok, "Pallas output mismatch vs reference"
    print("KERNEL_OK")
</pallas_src>

<mosaic_0001>
module attributes {stable_mosaic.version = 11 : i64} {
  func.func @_conv_relu_pool_kernel(%arg0: i32, %arg1: memref<128x27xf32, #tpu.memory_space<vmem>>, %arg2: memref<128x27xf32, #tpu.memory_space<vmem>>, %arg3: memref<128x27xf32, #tpu.memory_space<vmem>>, %arg4: memref<128x27xf32, #tpu.memory_space<vmem>>, %arg5: memref<27x16xf32, #tpu.memory_space<vmem>>, %arg6: memref<1x16xf32, #tpu.memory_space<vmem>>, %arg7: memref<128x16xf32, #tpu.memory_space<vmem>>, %arg8: memref<16x128xf32, #tpu.memory_space<vmem>>) attributes {dimension_semantics = [#tpu.dimension_semantics<parallel>], iteration_bounds = array<i64: 4>, scalar_prefetch = 0 : i64, scratch_operands = 0 : i64, tpu.core_type = #tpu.core_type<tc>, window_params = [{transform_indices = @transform_0, window_bounds = array<i64: 128, 27>}, {transform_indices = @transform_1, window_bounds = array<i64: 128, 27>}, {transform_indices = @transform_2, window_bounds = array<i64: 128, 27>}, {transform_indices = @transform_3, window_bounds = array<i64: 128, 27>}, {pipeline_mode = #tpu.pipeline_mode<synchronous>, transform_indices = @transform_4, window_bounds = array<i64: 27, 16>}, {pipeline_mode = #tpu.pipeline_mode<synchronous>, transform_indices = @transform_5, window_bounds = array<i64: 1, 16>}, {transform_indices = @transform_6, window_bounds = array<i64: 128, 16>}, {transform_indices = @transform_7, window_bounds = array<i64: 16, 128>}]} {
    %c0 = arith.constant 0 : index
    %c0_0 = arith.constant 0 : index
    %0 = vector.load %arg5[%c0, %c0_0] : memref<27x16xf32, #tpu.memory_space<vmem>>, vector<27x16xf32>
    %c0_1 = arith.constant 0 : index
    %c0_2 = arith.constant 0 : index
    %1 = vector.load %arg6[%c0_1, %c0_2] : memref<1x16xf32, #tpu.memory_space<vmem>>, vector<1x16xf32>
    %c0_3 = arith.constant 0 : index
    %c0_4 = arith.constant 0 : index
    %2 = vector.load %arg1[%c0_3, %c0_4] : memref<128x27xf32, #tpu.memory_space<vmem>>, vector<128x27xf32>
    %cst = arith.constant dense<0.000000e+00> : vector<128x16xf32>
    %3 = tpu.matmul %2, %0, %cst {dimension_numbers = #tpu.dot_dimension_numbers<[1], [0], [0], [1], [0, 0, 1, 1], [], []>} : vector<128x27xf32>, vector<27x16xf32>, vector<128x16xf32> -> vector<128x16xf32>
    %4 = vector.broadcast %1 : vector<1x16xf32> to vector<128x16xf32>
    %5 = arith.addf %3, %4 : vector<128x16xf32>
    %cst_5 = arith.constant 0.000000e+00 : f32
    %6 = vector.broadcast %cst_5 : f32 to vector<128x16xf32>
    %7 = arith.maximumf %5, %6 : vector<128x16xf32>
    %c0_6 = arith.constant 0 : index
    %c0_7 = arith.constant 0 : index
    %8 = vector.load %arg2[%c0_6, %c0_7] : memref<128x27xf32, #tpu.memory_space<vmem>>, vector<128x27xf32>
    %cst_8 = arith.constant dense<0.000000e+00> : vector<128x16xf32>
    %9 = tpu.matmul %8, %0, %cst_8 {dimension_numbers = #tpu.dot_dimension_numbers<[1], [0], [0], [1], [0, 0, 1, 1], [], []>} : vector<128x27xf32>, vector<27x16xf32>, vector<128x16xf32> -> vector<128x16xf32>
    %10 = vector.broadcast %1 : vector<1x16xf32> to vector<128x16xf32>
    %11 = arith.addf %9, %10 : vector<128x16xf32>
    %cst_9 = arith.constant 0.000000e+00 : f32
    %12 = vector.broadcast %cst_9 : f32 to vector<128x16xf32>
    %13 = arith.maximumf %11, %12 : vector<128x16xf32>
    %14 = arith.addf %7, %13 : vector<128x16xf32>
    %c0_10 = arith.constant 0 : index
    %c0_11 = arith.constant 0 : index
    %15 = vector.load %arg3[%c0_10, %c0_11] : memref<128x27xf32, #tpu.memory_space<vmem>>, vector<128x27xf32>
    %cst_12 = arith.constant dense<0.000000e+00> : vector<128x16xf32>
    %16 = tpu.matmul %15, %0, %cst_12 {dimension_numbers = #tpu.dot_dimension_numbers<[1], [0], [0], [1], [0, 0, 1, 1], [], []>} : vector<128x27xf32>, vector<27x16xf32>, vector<128x16xf32> -> vector<128x16xf32>
    %17 = vector.broadcast %1 : vector<1x16xf32> to vector<128x16xf32>
    %18 = arith.addf %16, %17 : vector<128x16xf32>
    %cst_13 = arith.constant 0.000000e+00 : f32
    %19 = vector.broadcast %cst_13 : f32 to vector<128x16xf32>
    %20 = arith.maximumf %18, %19 : vector<128x16xf32>
    %21 = arith.addf %14, %20 : vector<128x16xf32>
    %c0_14 = arith.constant 0 : index
    %c0_15 = arith.constant 0 : index
    %22 = vector.load %arg4[%c0_14, %c0_15] : memref<128x27xf32, #tpu.memory_space<vmem>>, vector<128x27xf32>
    %cst_16 = arith.constant dense<0.000000e+00> : vector<128x16xf32>
    %23 = tpu.matmul %22, %0, %cst_16 {dimension_numbers = #tpu.dot_dimension_numbers<[1], [0], [0], [1], [0, 0, 1, 1], [], []>} : vector<128x27xf32>, vector<27x16xf32>, vector<128x16xf32> -> vector<128x16xf32>
    %24 = vector.broadcast %1 : vector<1x16xf32> to vector<128x16xf32>
    %25 = arith.addf %23, %24 : vector<128x16xf32>
    %cst_17 = arith.constant 0.000000e+00 : f32
    %26 = vector.broadcast %cst_17 : f32 to vector<128x16xf32>
    %27 = arith.maximumf %25, %26 : vector<128x16xf32>
    %28 = arith.addf %21, %27 : vector<128x16xf32>
    %cst_18 = arith.constant 2.500000e-01 : f32
    %29 = vector.broadcast %cst_18 : f32 to vector<128x16xf32>
    %30 = arith.mulf %28, %29 : vector<128x16xf32>
    %c0_19 = arith.constant 0 : index
    %c0_20 = arith.constant 0 : index
    %31 = vector.load %arg7[%c0_19, %c0_20] : memref<128x16xf32, #tpu.memory_space<vmem>>, vector<128x16xf32>
    tpu.vector_store %arg7[%c0_19, %c0_20], %30 {strides = array<i32>} : memref<128x16xf32, #tpu.memory_space<vmem>>, vector<128x16xf32>,
    %32 = tpu.transpose %30, [1, 0] : vector<128x16xf32> -> vector<16x128xf32>
    %c0_21 = arith.constant 0 : index
    %c0_22 = arith.constant 0 : index
    %33 = vector.load %arg8[%c0_21, %c0_22] : memref<16x128xf32, #tpu.memory_space<vmem>>, vector<16x128xf32>
    tpu.vector_store %arg8[%c0_21, %c0_22], %32 {strides = array<i32>} : memref<16x128xf32, #tpu.memory_space<vmem>>, vector<16x128xf32>,
    return
  }
  func.func @transform_0(%arg0: i32) -> (i32, i32) {
    %c0_i32 = arith.constant 0 : i32
    %c0_i32_0 = arith.constant 0 : i32
    return %arg0, %c0_i32 : i32, i32
  }
  func.func @transform_1(%arg0: i32) -> (i32, i32) {
    %c0_i32 = arith.constant 0 : i32
    %c0_i32_0 = arith.constant 0 : i32
    return %arg0, %c0_i32 : i32, i32
  }
  func.func @transform_2(%arg0: i32) -> (i32, i32) {
    %c0_i32 = arith.constant 0 : i32
    %c0_i32_0 = arith.constant 0 : i32
    return %arg0, %c0_i32 : i32, i32
  }
  func.func @transform_3(%arg0: i32) -> (i32, i32) {
    %c0_i32 = arith.constant 0 : i32
    %c0_i32_0 = arith.constant 0 : i32
    return %arg0, %c0_i32 : i32, i32
  }
  func.func @transform_4(%arg0: i32) -> (i32, i32) {
    %c0_i32 = arith.constant 0 : i32
    %c0_i32_0 = arith.constant 0 : i32
    %c0_i32_1 = arith.constant 0 : i32
    return %c0_i32, %c0_i32_0 : i32, i32
  }
  func.func @transform_5(%arg0: i32) -> (i32, i32) {
    %c0_i32 = arith.constant 0 : i32
    %c0_i32_0 = arith.constant 0 : i32
    %c0_i32_1 = arith.constant 0 : i32
    return %c0_i32, %c0_i32_0 : i32, i32
  }
  func.func @transform_6(%arg0: i32) -> (i32, i32) {
    %c0_i32 = arith.constant 0 : i32
    %c0_i32_0 = arith.constant 0 : i32
    return %arg0, %c0_i32 : i32, i32
  }
  func.func @transform_7(%arg0: i32) -> (i32, i32) {
    %c0_i32 = arith.constant 0 : i32
    %c0_i32_0 = arith.constant 0 : i32
    return %c0_i32, %arg0 : i32, i32
  }
}

</mosaic_0001>

<bundles_post_ra>
// kernel: tpu_custom_call.1
= control target key start
LH: loop header
LB: loop body
LE: loop exit
PB: predicated region body
PF: predicated region fallthrough
CT: control target
= control target key end

     0   :  { %13 = vsyncpa [#allocation3], 0  ;;  %s1805_s0 = inlined_call_operand.vmem [shape: f32[512,27], index: 0, kind: input, shape index: {}]   ;;  %s1806_s1 = inlined_call_operand.vmem [shape: f32[512,27], index: 1, kind: input, shape index: {}]   ;;  %s1807_s2 = inlined_call_operand.vmem [shape: f32[512,27], index: 2, kind: input, shape index: {}]   ;;  %s1808_s3 = inlined_call_operand.vmem [shape: f32[512,27], index: 3, kind: input, shape index: {}]   ;;  %s1809_s4 = inlined_call_operand.vmem [shape: f32[27,16], index: 4, kind: input, shape index: {}]   ;;  %s1810_s5 = inlined_call_operand.vmem [shape: f32[1,16], index: 5, kind: input, shape index: {}]   ;;  %s1811_s6 = inlined_call_operand.vmem [shape: f32[512,16], index: 6, kind: output, shape index: {0}]   ;;  %s1812_s7 = inlined_call_operand.hbm [shape: f32[16,512], index: 7, kind: output, shape index: {1}]  }
   0x1   :  { %15 = vsyncpa [#allocation3 + $0x1], 0  ;;  %s1451_s24 = smov 0   ;;  %s1453_s25 = smov 0  }
   0x2   :  { %s1455_s26 = smov 0   ;;  %s1457_s27 = smov 0  }
   0x3 LB: > { %s1472_s28 = sadd.s32 4294967295, %s1406_s27   ;;  %s1214_s29 = sadd.s32 4294967294, %s1406_s27   ;;  %s1406_s27 = sphi %s1457_s27, %s1818_s27   ;;  %s1402_s26 = sphi %s1455_s26, %s1817_s26   ;;  %s1398_s25 = sphi %s1453_s25, %s1816_s25   ;;  %s1394_s24 = sphi %s1451_s24, %s1815_s24  }
   0x4   : > { %s1476_s30 = sadd.s32 1, %s1406_s27   ;;  %s200_s8 = sadd.s32 1, %s1402_s26 }
   0x5   : > { %s197_s9 = ssub.s32 %s1406_s27, %s1476_s30  ;;  %p210_p0 = scmp.ne.s32.totalorder %s1402_s26, %s1398_s25 }
   0x6   : > { %p198_p1 = scmp.eq.s32.totalorder %s197_s9, 0  ;;  %p211_p2 = scmp.eq.s32.totalorder %s1472_s28, 3 }
   0x7   : > { %p216_p3 = scmp.ne.s32.totalorder %s1398_s25, %s1394_s24  ;;  %p217_p4 = scmp.eq.s32.totalorder %s1214_s29, 3 }
   0x8   : > { %s1487_s10 = scalar_select %p198_p1, %s1402_s26, %s200_s8  }
   0x9   : > { %p1489_p5 = por %p211_p2, %p210_p0  ;;  %p1493_p6 = por %p217_p4, %p216_p3 }
   0xa   : > { %p1217_p7 = scmp.ge.s32.totalorder %s1406_s27, 1  ;;  %p277_p8 = scmp.lt.s32.totalorder %s1406_s27, 5 }
   0xc   : > { %p278_p9 = pnand %p1217_p7, %p277_p8 }
   0xd   : > { %s1219_s17 = sshll.u32 (!%p278_p9), %s1472_s28, 4 }
   0xe   : > { %281 = sbr.rel (%p278_p9) target bundleno = 347 (0x15b), region = 44  ;;  %p330_p10 = scmp.lt.s32.totalorder (!%p278_p9), %s1219_s17, 63 }
  0x13   : > { %v362_v0 = vld [vmem:[%s1809_s4 + $0x18] sm:$0x7]  ;;  %vm432_vm0 = vcmask 1042432   ;;  %v361_v1 = vld [vmem:[%s1809_s4 + $0x10] sm:$0xff]  ;;  %v360_v2 = vld [vmem:[%s1809_s4 + $0x8] sm:$0xff]  ;;  %s1820_s17 = smov (!%p330_p10, %s1219_s17), 63 }
  0x14   : > { %1263 = vmatpush.msk.msra.mxu2 %vm432_vm0, %v362_v0  ;;  %1280 = vmatpush.msk.msra.mxu3 %vm432_vm0, %v362_v0  ;;  %v359_v3 = vld [vmem:[%s1809_s4] sm:$0xff]  ;;  %s1512_s22 = sshll.u32 %s1820_s17, 3  ;;  %vm383_vm1 = vcmask 220160   ;;  %vm1016_vm2 = vcmask 130048  }
  0x15   : > { %1229 = vmatpush.msk.msra.mxu0 %vm432_vm0, %v362_v0  ;;  %1246 = vmatpush.msk.msra.mxu1 %vm432_vm0, %v362_v0  ;;  %s1518_s8 = scalar_lea.vmem %s1807_s2, %s1512_s22  ;;  %s1524_s14 = scalar_lea.vmem %s1808_s3, %s1512_s22 }
  0x16   : > { %755 = vmatpush.msra.mxu2 %v361_v1  ;;  %916 = vmatpush.msra.mxu3 %v361_v1  ;;  %v678_v4 = vld [vmem:[%s1518_s8] sm:$0xff]  ;;  %s1532_s17 = scalar_lea.vmem %s1805_s0, %s1512_s22  ;;  %s1538_s20 = scalar_lea.vmem %s1806_s1, %s1512_s22  ;;  %v679_v8 = vld [vmem:[%s1518_s8 + $0x8] sm:$0xff]  ;;  %v680_v12 = vld [vmem:[%s1518_s8 + $0x10] sm:$0xff] }
  0x17   : > { %449 = vmatpush.msra.mxu0 %v361_v1  ;;  %594 = vmatpush.msra.mxu1 %v361_v1  ;;  %v839_v5 = vld [vmem:[%s1524_s14] sm:$0xff]  ;;  %v840_v9 = vld [vmem:[%s1524_s14 + $0x8] sm:$0xff]  ;;  %v841_v13 = vld [vmem:[%s1524_s14 + $0x10] sm:$0xff]  ;;  %s1681_s9 = scalar_lea.vmem %s1811_s6, %s1512_s22  ;;  %s326_s22 = sand.u32 1, %s1398_s25  }
  0x18   : > { %756 = vmatpush.msra.mxu2 %v360_v2  ;;  %917 = vmatpush.msra.mxu3 %v360_v2  ;;  %v364_v6 = vld [vmem:[%s1532_s17] sm:$0xff]  ;;  %v365_v10 = vld [vmem:[%s1532_s17 + $0x8] sm:$0xff]  ;;  %v366_v14 = vld [vmem:[%s1532_s17 + $0x10] sm:$0xff]  ;;  %s1218_s13 = sshll.u32 %s326_s22, 4  ;;  %s1073_s21 = scalar_lea.sflag [#allocation3], %s326_s22 }
  0x19   : > { %450 = vmatpush.msra.mxu0 %v360_v2  ;;  %595 = vmatpush.msra.mxu1 %v360_v2  ;;  %v517_v7 = vld [vmem:[%s1538_s20] sm:$0xff]  ;;  %v518_v11 = vld [vmem:[%s1538_s20 + $0x8] sm:$0xff]  ;;  %v519_v15 = vld [vmem:[%s1538_s20 + $0x10] sm:$0xff]  ;;  %s328_s18 = scalar_lea.vmem [#allocation2], %s1218_s13 }
  0x1a   : > { %757 = vmatpush.msra.mxu2 %v359_v3  ;;  %918 = vmatpush.msra.mxu3 %v359_v3  ;;  %v681_v16 = vld [vmem:[%s1518_s8 + $0x18] sm:$0xff]  ;;  %v682_v20 = vld [vmem:[%s1518_s8 + $0x20] sm:$0xff]  ;;  %v683_v24 = vld [vmem:[%s1518_s8 + $0x28] sm:$0xff]  ;;  %s1088_s19 = sshll.u32 %s328_s18, 4  ;;  %s1089_s19 = int_to_ptr.vmem [resolvable:$true] %s1088_s19 }
  0x1b   : > { %1264 = vmatmul.msk.f32.vlgmr.msra.gmra.mxu2 %vm383_vm1, %v678_v4  ;;  %1281 = vmatmul.msk.f32.vlgmr.msra.gmra.mxu3 %vm383_vm1, %v839_v5  ;;  %v842_v17 = vld [vmem:[%s1524_s14 + $0x18] sm:$0xff]  ;;  %v843_v21 = vld [vmem:[%s1524_s14 + $0x20] sm:$0xff]  ;;  %v844_v25 = vld [vmem:[%s1524_s14 + $0x28] sm:$0xff] }
  0x1c   : > { %451 = vmatpush.msra.mxu0 %v359_v3  ;;  %596 = vmatpush.msra.mxu1 %v359_v3  ;;  %v367_v18 = vld [vmem:[%s1532_s17 + $0x18] sm:$0xff]  ;;  %v368_v22 = vld [vmem:[%s1532_s17 + $0x20] sm:$0xff]  ;;  %v369_v26 = vld [vmem:[%s1532_s17 + $0x28] sm:$0xff] }
  0x1d   : > { %1230 = vmatmul.msk.f32.vlgmr.msra.gmra.mxu0 %vm383_vm1, %v364_v6  ;;  %1247 = vmatmul.msk.f32.vlgmr.msra.gmra.mxu1 %vm383_vm1, %v517_v7  ;;  %v520_v19 = vld [vmem:[%s1538_s20 + $0x18] sm:$0xff]  ;;  %v521_v23 = vld [vmem:[%s1538_s20 + $0x20] sm:$0xff]  ;;  %v522_v27 = vld [vmem:[%s1538_s20 + $0x28] sm:$0xff] }
  0x1e   : > { %v684_v28 = vld [vmem:[%s1518_s8 + $0x30] sm:$0xff]  ;;  %v685_v32 = vld [vmem:[%s1518_s8 + $0x38] sm:$0xff]  ;;  %v686_v36 = vld [vmem:[%s1518_s8 + $0x40] sm:$0xff] }
  0x1f   : > { %v845_v29 = vld [vmem:[%s1524_s14 + $0x30] sm:$0xff]  ;;  %v846_v33 = vld [vmem:[%s1524_s14 + $0x38] sm:$0xff]  ;;  %v847_v37 = vld [vmem:[%s1524_s14 + $0x40] sm:$0xff] }
  0x20   : > { %v370_v30 = vld [vmem:[%s1532_s17 + $0x30] sm:$0xff]  ;;  %v371_v34 = vld [vmem:[%s1532_s17 + $0x38] sm:$0xff]  ;;  %v372_v38 = vld [vmem:[%s1532_s17 + $0x40] sm:$0xff] }
  0x21   : > { %v523_v31 = vld [vmem:[%s1538_s20 + $0x30] sm:$0xff]  ;;  %v524_v35 = vld [vmem:[%s1538_s20 + $0x38] sm:$0xff]  ;;  %v525_v39 = vld [vmem:[%s1538_s20 + $0x40] sm:$0xff] }
  0x22   : > { %v687_v40 = vld [vmem:[%s1518_s8 + $0x48] sm:$0xff]  ;;  %v688_v44 = vld [vmem:[%s1518_s8 + $0x50] sm:$0xff]  ;;  %v689_v48 = vld [vmem:[%s1518_s8 + $0x58] sm:$0xff] }
  0x23   : > { %1265 = vmatmul.msk.f32.gmra.mxu2 %vm383_vm1, %v679_v8  ;;  %1282 = vmatmul.msk.f32.gmra.mxu3 %vm383_vm1, %v840_v9  ;;  %v848_v41 = vld [vmem:[%s1524_s14 + $0x48] sm:$0xff]  ;;  %v849_v45 = vld [vmem:[%s1524_s14 + $0x50] sm:$0xff]  ;;  %v850_v49 = vld [vmem:[%s1524_s14 + $0x58] sm:$0xff] }
  0x24   : > { %v373_v42 = vld [vmem:[%s1532_s17 + $0x48] sm:$0xff]  ;;  %v374_v46 = vld [vmem:[%s1532_s17 + $0x50] sm:$0xff]  ;;  %v375_v50 = vld [vmem:[%s1532_s17 + $0x58] sm:$0xff] }
  0x25   : > { %1231 = vmatmul.msk.f32.gmra.mxu0 %vm383_vm1, %v365_v10  ;;  %1248 = vmatmul.msk.f32.gmra.mxu1 %vm383_vm1, %v518_v11  ;;  %v526_v43 = vld [vmem:[%s1538_s20 + $0x48] sm:$0xff]  ;;  %v527_v47 = vld [vmem:[%s1538_s20 + $0x50] sm:$0xff]  ;;  %v528_v51 = vld [vmem:[%s1538_s20 + $0x58] sm:$0xff] }
  0x26   : > { %v690_v52 = vld [vmem:[%s1518_s8 + $0x60] sm:$0xff]  ;;  %v691_v56 = vld [vmem:[%s1518_s8 + $0x68] sm:$0xff]  ;;  %v692_v60 = vld [vmem:[%s1518_s8 + $0x70] sm:$0xff] }
  0x27   : > { %v851_v53 = vld [vmem:[%s1524_s14 + $0x60] sm:$0xff]  ;;  %v852_v57 = vld [vmem:[%s1524_s14 + $0x68] sm:$0xff]  ;;  %v853_v61 = vld [vmem:[%s1524_s14 + $0x70] sm:$0xff] }
  0x28   : > { %v376_v54 = vld [vmem:[%s1532_s17 + $0x60] sm:$0xff]  ;;  %v377_v58 = vld [vmem:[%s1532_s17 + $0x68] sm:$0xff]  ;;  %v378_v62 = vld [vmem:[%s1532_s17 + $0x70] sm:$0xff] }
  0x29   : > { %v529_v55 = vld [vmem:[%s1538_s20 + $0x60] sm:$0xff]  ;;  %v530_v59 = vld [vmem:[%s1538_s20 + $0x68] sm:$0xff]  ;;  %v531_v63 = vld [vmem:[%s1538_s20 + $0x70] sm:$0xff] }
  0x2a   : > { %v693_v0 = vld [vmem:[%s1518_s8 + $0x78] sm:$0xff]  ;;  %v1669_v4 = vld [vmem:[%s1810_s5] ss:$0 sm:$0xff] }
  0x2b   : > { %1266 = vmatmul.msk.f32.gmra.mxu2 %vm383_vm1, %v680_v12  ;;  %1283 = vmatmul.msk.f32.gmra.mxu3 %vm383_vm1, %v841_v13  ;;  %v854_v1 = vld [vmem:[%s1524_s14 + $0x78] sm:$0xff]  ;;  %s1298_s14 = sshll.u32 %s1472_s28, 3 }
  0x2c   : > { %v379_v2 = vld [vmem:[%s1532_s17 + $0x78] sm:$0xff]  ;;  %s1087_s17 = scalar_lea.hbm %s1812_s7, %s1298_s14 }
  0x2d   : > { %1232 = vmatmul.msk.f32.gmra.mxu0 %vm383_vm1, %v366_v14  ;;  %1249 = vmatmul.msk.f32.gmra.mxu1 %vm383_vm1, %v519_v15  ;;  %v532_v3 = vld [vmem:[%s1538_s20 + $0x78] sm:$0xff]  ;;  %s1090_s20 = sshll.u32 %s1087_s17, 4  ;;  %s1091_s20 = int_to_ptr.hbm [resolvable:$true] %s1090_s20 }
  0x2e   : > { %s1358_s23 = sshra.s32 %s1091_s20, 4  ;;  %s1359_s23 = int_to_ptr.hbm [resolvable:$true] %s1358_s23 }
  0x2f   : > { %s1360_s29 = scalar_lea.hbm %s1359_s23, 16  ;;  %p1365_p0 = scmp.lt.s32.totalorder %s1359_s23, %s1812_s7 }
  0x30   : > { %p1361_p11 = scmp.ne.s32.totalorder %s1359_s23, %s1360_s29 }
  0x32   : > { %p1362_p12 = pnand %p1361_p11, %p1489_p5 }
  0x33   : > { %1267 = vmatmul.msk.f32.gmra.mxu2 %vm383_vm1, %v681_v16  ;;  %1284 = vmatmul.msk.f32.gmra.mxu3 %vm383_vm1, %v842_v17 }
  0x34   : > { %p1363_p13 = pneg %p1362_p12 }
  0x35   : > { %1233 = vmatmul.msk.f32.gmra.mxu0 %vm383_vm1, %v367_v18  ;;  %1250 = vmatmul.msk.f32.gmra.mxu1 %vm383_vm1, %v520_v19 }
  0x3b   : > { %1268 = vmatmul.msk.f32.gmra.mxu2 %vm383_vm1, %v682_v20  ;;  %1285 = vmatmul.msk.f32.gmra.mxu3 %vm383_vm1, %v843_v21 }
  0x3d   : > { %1234 = vmatmul.msk.f32.gmra.mxu0 %vm383_vm1, %v368_v22  ;;  %1251 = vmatmul.msk.f32.gmra.mxu1 %vm383_vm1, %v521_v23 }
  0x43   : > { %1269 = vmatmul.msk.f32.gmra.mxu2 %vm383_vm1, %v683_v24  ;;  %1286 = vmatmul.msk.f32.gmra.mxu3 %vm383_vm1, %v844_v25 }
  0x45   : > { %1235 = vmatmul.msk.f32.gmra.mxu0 %vm383_vm1, %v369_v26  ;;  %1252 = vmatmul.msk.f32.gmra.mxu1 %vm383_vm1, %v522_v27 }
  0x4b   : > { %1270 = vmatmul.msk.f32.gmra.mxu2 %vm383_vm1, %v684_v28  ;;  %1287 = vmatmul.msk.f32.gmra.mxu3 %vm383_vm1, %v845_v29 }
  0x4d   : > { %1236 = vmatmul.msk.f32.gmra.mxu0 %vm383_vm1, %v370_v30  ;;  %1253 = vmatmul.msk.f32.gmra.mxu1 %vm383_vm1, %v523_v31 }
  0x53   : > { %1271 = vmatmul.msk.f32.gmra.mxu2 %vm383_vm1, %v685_v32  ;;  %1288 = vmatmul.msk.f32.gmra.mxu3 %vm383_vm1, %v846_v33 }
  0x55   : > { %1237 = vmatmul.msk.f32.gmra.mxu0 %vm383_vm1, %v371_v34  ;;  %1254 = vmatmul.msk.f32.gmra.mxu1 %vm383_vm1, %v524_v35 }
  0x5b   : > { %1272 = vmatmul.msk.f32.gmra.mxu2 %vm383_vm1, %v686_v36  ;;  %1289 = vmatmul.msk.f32.gmra.mxu3 %vm383_vm1, %v847_v37 }
  0x5d   : > { %1238 = vmatmul.msk.f32.gmra.mxu0 %vm383_vm1, %v372_v38  ;;  %1255 = vmatmul.msk.f32.gmra.mxu1 %vm383_vm1, %v525_v39 }
  0x63   : > { %1273 = vmatmul.msk.f32.gmra.mxu2 %vm383_vm1, %v687_v40  ;;  %1290 = vmatmul.msk.f32.gmra.mxu3 %vm383_vm1, %v848_v41 }
  0x65   : > { %1239 = vmatmul.msk.f32.gmra.mxu0 %vm383_vm1, %v373_v42  ;;  %1256 = vmatmul.msk.f32.gmra.mxu1 %vm383_vm1, %v526_v43 }
  0x6b   : > { %1274 = vmatmul.msk.f32.gmra.mxu2 %vm383_vm1, %v688_v44  ;;  %1291 = vmatmul.msk.f32.gmra.mxu3 %vm383_vm1, %v849_v45 }
  0x6d   : > { %1240 = vmatmul.msk.f32.gmra.mxu0 %vm383_vm1, %v374_v46  ;;  %1257 = vmatmul.msk.f32.gmra.mxu1 %vm383_vm1, %v527_v47 }
  0x73   : > { %1275 = vmatmul.msk.f32.gmra.mxu2 %vm383_vm1, %v689_v48  ;;  %1292 = vmatmul.msk.f32.gmra.mxu3 %vm383_vm1, %v850_v49 }
  0x75   : > { %1241 = vmatmul.msk.f32.gmra.mxu0 %vm383_vm1, %v375_v50  ;;  %1258 = vmatmul.msk.f32.gmra.mxu1 %vm383_vm1, %v528_v51 }
  0x7b   : > { %1276 = vmatmul.msk.f32.gmra.mxu2 %vm383_vm1, %v690_v52  ;;  %1293 = vmatmul.msk.f32.gmra.mxu3 %vm383_vm1, %v851_v53 }
  0x7d   : > { %1242 = vmatmul.msk.f32.gmra.mxu0 %vm383_vm1, %v376_v54  ;;  %1259 = vmatmul.msk.f32.gmra.mxu1 %vm383_vm1, %v529_v55 }
  0x83   : > { %1277 = vmatmul.msk.f32.gmra.mxu2 %vm383_vm1, %v691_v56  ;;  %1294 = vmatmul.msk.f32.gmra.mxu3 %vm383_vm1, %v852_v57 }
  0x85   : > { %1243 = vmatmul.msk.f32.gmra.mxu0 %vm383_vm1, %v377_v58  ;;  %1260 = vmatmul.msk.f32.gmra.mxu1 %vm383_vm1, %v530_v59 }
  0x8b   : > { %1278 = vmatmul.msk.f32.gmra.mxu2 %vm383_vm1, %v692_v60  ;;  %1295 = vmatmul.msk.f32.gmra.mxu3 %vm383_vm1, %v853_v61 }
  0x8d   : > { %1244 = vmatmul.msk.f32.gmra.mxu0 %vm383_vm1, %v378_v62  ;;  %1261 = vmatmul.msk.f32.gmra.mxu1 %vm383_vm1, %v531_v63 }
  0x93   : > { %1279 = vmatmul.msk.f32.gmra.mxu2 %vm383_vm1, %v693_v0  ;;  %1296 = vmatmul.msk.f32.gmra.mxu3 %vm383_vm1, %v854_v1 }
  0x95   : > { %1245 = vmatmul.msk.f32.gmra.mxu0 %vm383_vm1, %v379_v2  ;;  %1262 = vmatmul.msk.f32.gmra.mxu1 %vm383_vm1, %v532_v3 }
  0x9a   : > { %v453_v5 = vpop.f32.mrf.mxu0  ;;  %v598_v6 = vpop.f32.mrf.mxu1 }
  0x9b   : > { %v454_v7 = vadd.f32 %v1669_v4, %v453_v5  ;;  %v599_v8 = vadd.f32 %v1669_v4, %v598_v6 }
  0x9d   : > { %v501_v9 = vmax.f32 %v454_v7, 0.0  ;;  %v646_v10 = vmax.f32 %v599_v8, 0.0 }
  0x9e   : > { %v759_v11 = vpop.f32.mrf.mxu2  ;;  %v920_v12 = vpop.f32.mrf.mxu3 }
  0x9f   : > { %v662_v13 = vadd.f32 %v646_v10, %v501_v9  ;;  %v760_v14 = vadd.f32 %v1669_v4, %v759_v11  ;;  %v921_v15 = vadd.f32 %v1669_v4, %v920_v12 }
  0xa1   : > { %v807_v16 = vmax.f32 %v760_v14, 0.0  ;;  %v968_v17 = vmax.f32 %v921_v15, 0.0 }
  0xa2   : > { %v456_v18 = vpop.f32.mrf.mxu0  ;;  %v601_v19 = vpop.f32.mrf.mxu1 }
  0xa3   : > { %v823_v20 = vadd.f32 %v807_v16, %v662_v13  ;;  %v457_v21 = vadd.f32 %v1669_v4, %v456_v18  ;;  %v602_v22 = vadd.f32 %v1669_v4, %v601_v19 }
  0xa5   : > { %v502_v23 = vmax.f32 %v457_v21, 0.0  ;;  %v647_v24 = vmax.f32 %v602_v22, 0.0  ;;  %v984_v25 = vadd.f32 %v968_v17, %v823_v20 }
  0xa6   : > { %v762_v26 = vpop.f32.mrf.mxu2  ;;  %v923_v27 = vpop.f32.mrf.mxu3 }
  0xa7   : > { %v663_v28 = vadd.f32 %v647_v24, %v502_v23  ;;  %v763_v29 = vadd.f32 %v1669_v4, %v762_v26  ;;  %v924_v30 = vadd.f32 %v1669_v4, %v923_v27  ;;  %v1000_v31 = vmul.f32 0.25, %v984_v25 }
  0xa9   : > { %v808_v32 = vmax.f32 %v763_v29, 0.0  ;;  %v969_v33 = vmax.f32 %v924_v30, 0.0  ;;  %1017 = vst.msk [vmem:[%s1681_s9] sm:$0xff] %vm1016_vm2, %v1000_v31  ;;  %1033 = vxpose.xlu0.b32.start [1/16] (narrow) %v1000_v31, 16 }
  0xaa   : > { %v459_v34 = vpop.f32.mrf.mxu0  ;;  %v604_v35 = vpop.f32.mrf.mxu1 }
  0xab   : > { %v824_v36 = vadd.f32 %v808_v32, %v663_v28  ;;  %v460_v37 = vadd.f32 %v1669_v4, %v459_v34  ;;  %v605_v38 = vadd.f32 %v1669_v4, %v604_v35 }
  0xad   : > { %v503_v39 = vmax.f32 %v460_v37, 0.0  ;;  %v648_v40 = vmax.f32 %v605_v38, 0.0  ;;  %v985_v41 = vadd.f32 %v969_v33, %v824_v36 }
  0xae   : > { %v765_v42 = vpop.f32.mrf.mxu2  ;;  %v926_v43 = vpop.f32.mrf.mxu3 }
  0xaf   : > { %v664_v44 = vadd.f32 %v648_v40, %v503_v39  ;;  %v766_v45 = vadd.f32 %v1669_v4, %v765_v42  ;;  %v927_v46 = vadd.f32 %v1669_v4, %v926_v43  ;;  %v1001_v47 = vmul.f32 0.25, %v985_v41 }
  0xb1   : > { %v809_v48 = vmax.f32 %v766_v45, 0.0  ;;  %v970_v49 = vmax.f32 %v927_v46, 0.0  ;;  %1018 = vst.msk [vmem:[%s1681_s9 + $0x8] sm:$0xff] %vm1016_vm2, %v1001_v47  ;;  %1034 = vxpose.xlu0.b32.cont [2/16] (narrow) %v1001_v47, 16 }
  0xb2   : > { %v462_v50 = vpop.f32.mrf.mxu0  ;;  %v607_v51 = vpop.f32.mrf.mxu1 }
  0xb3   : > { %v825_v52 = vadd.f32 %v809_v48, %v664_v44  ;;  %v463_v53 = vadd.f32 %v1669_v4, %v462_v50  ;;  %v608_v54 = vadd.f32 %v1669_v4, %v607_v51 }
  0xb5   : > { %v504_v55 = vmax.f32 %v463_v53, 0.0  ;;  %v649_v56 = vmax.f32 %v608_v54, 0.0  ;;  %v986_v57 = vadd.f32 %v970_v49, %v825_v52 }
  0xb6   : > { %v768_v58 = vpop.f32.mrf.mxu2  ;;  %v929_v59 = vpop.f32.mrf.mxu3 }
  0xb7   : > { %v665_v60 = vadd.f32 %v649_v56, %v504_v55  ;;  %v769_v61 = vadd.f32 %v1669_v4, %v768_v58  ;;  %v930_v62 = vadd.f32 %v1669_v4, %v929_v59  ;;  %v1002_v63 = vmul.f32 0.25, %v986_v57 }
  0xb9   : > { %v810_v0 = vmax.f32 %v769_v61, 0.0  ;;  %v971_v1 = vmax.f32 %v930_v62, 0.0  ;;  %1019 = vst.msk [vmem:[%s1681_s9 + $0x10] sm:$0xff] %vm1016_vm2, %v1002_v63  ;;  %1035 = vxpose.xlu0.b32.cont [3/16] (narrow) %v1002_v63, 16 }
  0xba   : > { %v465_v2 = vpop.f32.mrf.mxu0  ;;  %v610_v3 = vpop.f32.mrf.mxu1 }
  0xbb   : > { %v826_v5 = vadd.f32 %v810_v0, %v665_v60  ;;  %v466_v6 = vadd.f32 %v1669_v4, %v465_v2  ;;  %v611_v7 = vadd.f32 %v1669_v4, %v610_v3 }
  0xbd   : > { %v505_v8 = vmax.f32 %v466_v6, 0.0  ;;  %v650_v9 = vmax.f32 %v611_v7, 0.0  ;;  %v987_v10 = vadd.f32 %v971_v1, %v826_v5 }
  0xbe   : > { %v771_v11 = vpop.f32.mrf.mxu2  ;;  %v932_v12 = vpop.f32.mrf.mxu3 }
  0xbf   : > { %v666_v13 = vadd.f32 %v650_v9, %v505_v8  ;;  %v772_v14 = vadd.f32 %v1669_v4, %v771_v11  ;;  %v933_v15 = vadd.f32 %v1669_v4, %v932_v12  ;;  %v1003_v16 = vmul.f32 0.25, %v987_v10 }
  0xc1   : > { %v811_v17 = vmax.f32 %v772_v14, 0.0  ;;  %v972_v18 = vmax.f32 %v933_v15, 0.0  ;;  %1020 = vst.msk [vmem:[%s1681_s9 + $0x18] sm:$0xff] %vm1016_vm2, %v1003_v16  ;;  %1036 = vxpose.xlu0.b32.cont [4/16] (narrow) %v1003_v16, 16 }
  0xc2   : > { %v468_v19 = vpop.f32.mrf.mxu0  ;;  %v613_v20 = vpop.f32.mrf.mxu1 }
  0xc3   : > { %v827_v21 = vadd.f32 %v811_v17, %v666_v13  ;;  %v469_v22 = vadd.f32 %v1669_v4, %v468_v19  ;;  %v614_v23 = vadd.f32 %v1669_v4, %v613_v20 }
  0xc5   : > { %v506_v24 = vmax.f32 %v469_v22, 0.0  ;;  %v651_v25 = vmax.f32 %v614_v23, 0.0  ;;  %v988_v26 = vadd.f32 %v972_v18, %v827_v21 }
  0xc6   : > { %v774_v27 = vpop.f32.mrf.mxu2  ;;  %v935_v28 = vpop.f32.mrf.mxu3 }
  0xc7   : > { %v667_v29 = vadd.f32 %v651_v25, %v506_v24  ;;  %v775_v30 = vadd.f32 %v1669_v4, %v774_v27  ;;  %v936_v31 = vadd.f32 %v1669_v4, %v935_v28  ;;  %v1004_v32 = vmul.f32 0.25, %v988_v26 }
  0xc9   : > { %v812_v33 = vmax.f32 %v775_v30, 0.0  ;;  %v973_v34 = vmax.f32 %v936_v31, 0.0  ;;  %1021 = vst.msk [vmem:[%s1681_s9 + $0x20] sm:$0xff] %vm1016_vm2, %v1004_v32  ;;  %1037 = vxpose.xlu0.b32.cont [5/16] (narrow) %v1004_v32, 16 }
  0xca   : > { %v471_v35 = vpop.f32.mrf.mxu0  ;;  %v616_v36 = vpop.f32.mrf.mxu1 }
  0xcb   : > { %v828_v37 = vadd.f32 %v812_v33, %v667_v29  ;;  %v472_v38 = vadd.f32 %v1669_v4, %v471_v35  ;;  %v617_v39 = vadd.f32 %v1669_v4, %v616_v36 }
  0xcd   : > { %v507_v40 = vmax.f32 %v472_v38, 0.0  ;;  %v652_v41 = vmax.f32 %v617_v39, 0.0  ;;  %v989_v42 = vadd.f32 %v973_v34, %v828_v37 }
  0xce   : > { %v777_v43 = vpop.f32.mrf.mxu2  ;;  %v938_v44 = vpop.f32.mrf.mxu3 }
  0xcf   : > { %v668_v45 = vadd.f32 %v652_v41, %v507_v40  ;;  %v778_v46 = vadd.f32 %v1669_v4, %v777_v43  ;;  %v939_v47 = vadd.f32 %v1669_v4, %v938_v44  ;;  %v1005_v48 = vmul.f32 0.25, %v989_v42 }
  0xd1   : > { %v813_v49 = vmax.f32 %v778_v46, 0.0  ;;  %v974_v50 = vmax.f32 %v939_v47, 0.0  ;;  %1022 = vst.msk [vmem:[%s1681_s9 + $0x28] sm:$0xff] %vm1016_vm2, %v1005_v48  ;;  %1038 = vxpose.xlu0.b32.cont [6/16] (narrow) %v1005_v48, 16 }
  0xd2   : > { %v474_v51 = vpop.f32.mrf.mxu0  ;;  %v619_v52 = vpop.f32.mrf.mxu1 }
  0xd3   : > { %v829_v53 = vadd.f32 %v813_v49, %v668_v45  ;;  %v475_v54 = vadd.f32 %v1669_v4, %v474_v51  ;;  %v620_v55 = vadd.f32 %v1669_v4, %v619_v52 }
  0xd5   : > { %v508_v56 = vmax.f32 %v475_v54, 0.0  ;;  %v653_v57 = vmax.f32 %v620_v55, 0.0  ;;  %v990_v58 = vadd.f32 %v974_v50, %v829_v53 }
  0xd6   : > { %v780_v59 = vpop.f32.mrf.mxu2  ;;  %v941_v60 = vpop.f32.mrf.mxu3 }
  0xd7   : > { %v669_v61 = vadd.f32 %v653_v57, %v508_v56  ;;  %v781_v62 = vadd.f32 %v1669_v4, %v780_v59  ;;  %v942_v63 = vadd.f32 %v1669_v4, %v941_v60  ;;  %v1006_v0 = vmul.f32 0.25, %v990_v58 }
  0xd9   : > { %v814_v1 = vmax.f32 %v781_v62, 0.0  ;;  %v975_v2 = vmax.f32 %v942_v63, 0.0  ;;  %1023 = vst.msk [vmem:[%s1681_s9 + $0x30] sm:$0xff] %vm1016_vm2, %v1006_v0  ;;  %1039 = vxpose.xlu0.b32.cont [7/16] (narrow) %v1006_v0, 16 }
  0xda   : > { %v477_v3 = vpop.f32.mrf.mxu0  ;;  %v622_v5 = vpop.f32.mrf.mxu1 }
  0xdb   : > { %v830_v6 = vadd.f32 %v814_v1, %v669_v61  ;;  %v478_v7 = vadd.f32 %v1669_v4, %v477_v3  ;;  %v623_v8 = vadd.f32 %v1669_v4, %v622_v5 }
  0xdd   : > { %v509_v9 = vmax.f32 %v478_v7, 0.0  ;;  %v654_v10 = vmax.f32 %v623_v8, 0.0  ;;  %v991_v11 = vadd.f32 %v975_v2, %v830_v6 }
  0xde   : > { %v783_v12 = vpop.f32.mrf.mxu2  ;;  %v944_v13 = vpop.f32.mrf.mxu3 }
  0xdf   : > { %v670_v14 = vadd.f32 %v654_v10, %v509_v9  ;;  %v784_v15 = vadd.f32 %v1669_v4, %v783_v12  ;;  %v945_v16 = vadd.f32 %v1669_v4, %v944_v13  ;;  %v1007_v17 = vmul.f32 0.25, %v991_v11 }
  0xe1   : > { %v815_v18 = vmax.f32 %v784_v15, 0.0  ;;  %v976_v19 = vmax.f32 %v945_v16, 0.0  ;;  %1024 = vst.msk [vmem:[%s1681_s9 + $0x38] sm:$0xff] %vm1016_vm2, %v1007_v17  ;;  %1040 = vxpose.xlu0.b32.cont [8/16] (narrow) %v1007_v17, 16 }
  0xe2   : > { %v480_v20 = vpop.f32.mrf.mxu0  ;;  %v625_v21 = vpop.f32.mrf.mxu1 }
  0xe3   : > { %v831_v22 = vadd.f32 %v815_v18, %v670_v14  ;;  %v481_v23 = vadd.f32 %v1669_v4, %v480_v20  ;;  %v626_v24 = vadd.f32 %v1669_v4, %v625_v21 }
  0xe5   : > { %v510_v25 = vmax.f32 %v481_v23, 0.0  ;;  %v655_v26 = vmax.f32 %v626_v24, 0.0  ;;  %v992_v27 = vadd.f32 %v976_v19, %v831_v22 }
  0xe6   : > { %v786_v28 = vpop.f32.mrf.mxu2  ;;  %v947_v29 = vpop.f32.mrf.mxu3 }
  0xe7   : > { %v671_v30 = vadd.f32 %v655_v26, %v510_v25  ;;  %v787_v31 = vadd.f32 %v1669_v4, %v786_v28  ;;  %v948_v32 = vadd.f32 %v1669_v4, %v947_v29  ;;  %v1008_v33 = vmul.f32 0.25, %v992_v27 }
  0xe9   : > { %v816_v34 = vmax.f32 %v787_v31, 0.0  ;;  %v977_v35 = vmax.f32 %v948_v32, 0.0  ;;  %1025 = vst.msk [vmem:[%s1681_s9 + $0x40] sm:$0xff] %vm1016_vm2, %v1008_v33  ;;  %1041 = vxpose.xlu0.b32.cont [9/16] (narrow) %v1008_v33, 16 }
  0xea   : > { %v483_v36 = vpop.f32.mrf.mxu0  ;;  %v628_v37 = vpop.f32.mrf.mxu1 }
  0xeb   : > { %v832_v38 = vadd.f32 %v816_v34, %v671_v30  ;;  %v484_v39 = vadd.f32 %v1669_v4, %v483_v36  ;;  %v629_v40 = vadd.f32 %v1669_v4, %v628_v37 }
  0xed   : > { %v511_v41 = vmax.f32 %v484_v39, 0.0  ;;  %v656_v42 = vmax.f32 %v629_v40, 0.0  ;;  %v993_v43 = vadd.f32 %v977_v35, %v832_v38 }
  0xee   : > { %v789_v44 = vpop.f32.mrf.mxu2  ;;  %v950_v45 = vpop.f32.mrf.mxu3 }
  0xef   : > { %v672_v46 = vadd.f32 %v656_v42, %v511_v41  ;;  %v790_v47 = vadd.f32 %v1669_v4, %v789_v44  ;;  %v951_v48 = vadd.f32 %v1669_v4, %v950_v45  ;;  %v1009_v49 = vmul.f32 0.25, %v993_v43 }
  0xf1   : > { %v817_v50 = vmax.f32 %v790_v47, 0.0  ;;  %v978_v51 = vmax.f32 %v951_v48, 0.0  ;;  %1026 = vst.msk [vmem:[%s1681_s9 + $0x48] sm:$0xff] %vm1016_vm2, %v1009_v49  ;;  %1042 = vxpose.xlu0.b32.cont [10/16] (narrow) %v1009_v49, 16 }
  0xf2   : > { %v486_v52 = vpop.f32.mrf.mxu0  ;;  %v631_v53 = vpop.f32.mrf.mxu1 }
  0xf3   : > { %v833_v54 = vadd.f32 %v817_v50, %v672_v46  ;;  %v487_v55 = vadd.f32 %v1669_v4, %v486_v52  ;;  %v632_v56 = vadd.f32 %v1669_v4, %v631_v53 }
  0xf5   : > { %v512_v57 = vmax.f32 %v487_v55, 0.0  ;;  %v657_v58 = vmax.f32 %v632_v56, 0.0  ;;  %v994_v59 = vadd.f32 %v978_v51, %v833_v54 }
  0xf6   : > { %v792_v60 = vpop.f32.mrf.mxu2  ;;  %v953_v61 = vpop.f32.mrf.mxu3 }
  0xf7   : > { %v673_v62 = vadd.f32 %v657_v58, %v512_v57  ;;  %v793_v63 = vadd.f32 %v1669_v4, %v792_v60  ;;  %v954_v0 = vadd.f32 %v1669_v4, %v953_v61  ;;  %v1010_v1 = vmul.f32 0.25, %v994_v59 }
  0xf9   : > { %v818_v2 = vmax.f32 %v793_v63, 0.0  ;;  %v979_v3 = vmax.f32 %v954_v0, 0.0  ;;  %1027 = vst.msk [vmem:[%s1681_s9 + $0x50] sm:$0xff] %vm1016_vm2, %v1010_v1  ;;  %1043 = vxpose.xlu0.b32.cont [11/16] (narrow) %v1010_v1, 16 }
  0xfa   : > { %v489_v5 = vpop.f32.mrf.mxu0  ;;  %v634_v6 = vpop.f32.mrf.mxu1 }
  0xfb   : > { %v834_v7 = vadd.f32 %v818_v2, %v673_v62  ;;  %v490_v8 = vadd.f32 %v1669_v4, %v489_v5  ;;  %v635_v9 = vadd.f32 %v1669_v4, %v634_v6 }
  0xfd   : > { %v513_v10 = vmax.f32 %v490_v8, 0.0  ;;  %v658_v11 = vmax.f32 %v635_v9, 0.0  ;;  %v995_v12 = vadd.f32 %v979_v3, %v834_v7 }
  0xfe   : > { %v795_v13 = vpop.f32.mrf.mxu2  ;;  %v956_v14 = vpop.f32.mrf.mxu3 }
  0xff   : > { %v674_v15 = vadd.f32 %v658_v11, %v513_v10  ;;  %v796_v16 = vadd.f32 %v1669_v4, %v795_v13  ;;  %v957_v17 = vadd.f32 %v1669_v4, %v956_v14  ;;  %v1011_v18 = vmul.f32 0.25, %v995_v12 }
 0x101   : > { %v819_v19 = vmax.f32 %v796_v16, 0.0  ;;  %v980_v20 = vmax.f32 %v957_v17, 0.0  ;;  %1028 = vst.msk [vmem:[%s1681_s9 + $0x58] sm:$0xff] %vm1016_vm2, %v1011_v18  ;;  %1044 = vxpose.xlu0.b32.cont [12/16] (narrow) %v1011_v18, 16 }
 0x102   : > { %v492_v21 = vpop.f32.mrf.mxu0  ;;  %v637_v22 = vpop.f32.mrf.mxu1 }
 0x103   : > { %v835_v23 = vadd.f32 %v819_v19, %v674_v15  ;;  %v493_v24 = vadd.f32 %v1669_v4, %v492_v21  ;;  %v638_v25 = vadd.f32 %v1669_v4, %v637_v22 }
 0x105   : > { %v514_v26 = vmax.f32 %v493_v24, 0.0  ;;  %v659_v27 = vmax.f32 %v638_v25, 0.0  ;;  %v996_v28 = vadd.f32 %v980_v20, %v835_v23 }
 0x106   : > { %v798_v29 = vpop.f32.mrf.mxu2  ;;  %v959_v30 = vpop.f32.mrf.mxu3 }
 0x107   : > { %v675_v31 = vadd.f32 %v659_v27, %v514_v26  ;;  %v799_v32 = vadd.f32 %v1669_v4, %v798_v29  ;;  %v960_v33 = vadd.f32 %v1669_v4, %v959_v30  ;;  %v1012_v34 = vmul.f32 0.25, %v996_v28 }
 0x109   : > { %v820_v35 = vmax.f32 %v799_v32, 0.0  ;;  %v981_v36 = vmax.f32 %v960_v33, 0.0  ;;  %1029 = vst.msk [vmem:[%s1681_s9 + $0x60] sm:$0xff] %vm1016_vm2, %v1012_v34  ;;  %1045 = vxpose.xlu0.b32.cont [13/16] (narrow) %v1012_v34, 16 }
 0x10a   : > { %v495_v37 = vpop.f32.mrf.mxu0  ;;  %v640_v38 = vpop.f32.mrf.mxu1 }
 0x10b   : > { %v836_v39 = vadd.f32 %v820_v35, %v675_v31  ;;  %v496_v40 = vadd.f32 %v1669_v4, %v495_v37  ;;  %v641_v41 = vadd.f32 %v1669_v4, %v640_v38 }
 0x10d   : > { %v515_v42 = vmax.f32 %v496_v40, 0.0  ;;  %v660_v43 = vmax.f32 %v641_v41, 0.0  ;;  %v997_v44 = vadd.f32 %v981_v36, %v836_v39 }
 0x10e   : > { %v801_v45 = vpop.f32.mrf.mxu2  ;;  %v962_v46 = vpop.f32.mrf.mxu3 }
 0x10f   : > { %v676_v47 = vadd.f32 %v660_v43, %v515_v42  ;;  %v802_v48 = vadd.f32 %v1669_v4, %v801_v45  ;;  %v963_v49 = vadd.f32 %v1669_v4, %v962_v46  ;;  %v1013_v50 = vmul.f32 0.25, %v997_v44 }
 0x111   : > { %v821_v51 = vmax.f32 %v802_v48, 0.0  ;;  %v982_v52 = vmax.f32 %v963_v49, 0.0  ;;  %1030 = vst.msk [vmem:[%s1681_s9 + $0x68] sm:$0xff] %vm1016_vm2, %v1013_v50  ;;  %1046 = vxpose.xlu0.b32.cont [14/16] (narrow) %v1013_v50, 16 }
 0x112   : > { %v498_v53 = vpop.f32.mrf.mxu0  ;;  %v643_v54 = vpop.f32.mrf.mxu1 }
 0x113   : > { %v837_v55 = vadd.f32 %v821_v51, %v676_v47  ;;  %v499_v56 = vadd.f32 %v1669_v4, %v498_v53  ;;  %v644_v57 = vadd.f32 %v1669_v4, %v643_v54 }
 0x115   : > { %v516_v58 = vmax.f32 %v499_v56, 0.0  ;;  %v661_v59 = vmax.f32 %v644_v57, 0.0  ;;  %v998_v60 = vadd.f32 %v982_v52, %v837_v55 }
 0x116   : > { %v804_v61 = vpop.f32.mrf.mxu2  ;;  %v965_v62 = vpop.f32.mrf.mxu3 }
 0x117   : > { %v677_v63 = vadd.f32 %v661_v59, %v516_v58  ;;  %v805_v0 = vadd.f32 %v1669_v4, %v804_v61  ;;  %v966_v1 = vadd.f32 %v1669_v4, %v965_v62  ;;  %v1014_v2 = vmul.f32 0.25, %v998_v60 }
 0x119   : > { %v822_v3 = vmax.f32 %v805_v0, 0.0  ;;  %v983_v5 = vmax.f32 %v966_v1, 0.0  ;;  %1031 = vst.msk [vmem:[%s1681_s9 + $0x70] sm:$0xff] %vm1016_vm2, %v1014_v2  ;;  %1047 = vxpose.xlu0.b32.cont [15/16] (narrow) %v1014_v2, 16 }
 0x11b   : > { %v838_v6 = vadd.f32 %v822_v3, %v677_v63 }
 0x11d   : > { %v999_v7 = vadd.f32 %v983_v5, %v838_v6 }
 0x11f   : > { %v1015_v8 = vmul.f32 0.25, %v999_v7 }
 0x121   : > { %1032 = vst.msk [vmem:[%s1681_s9 + $0x78] sm:$0xff] %vm1016_vm2, %v1015_v8  ;;  %1048 = vxpose.xlu0.b32.end [16/16] (narrow) %v1015_v8, 16  ;;  %s1364_s9 = scalar_lea.hbm %s1812_s7, 64 }
 0x122   : > { %p1366_p1 = scmp.lt.s32.totalorder %s1364_s9, %s1360_s29 }
 0x124   : > { %p1367_p2 = por %p1366_p1, %p1365_p0 }
 0x126   : > { %p1368_p3 = pnand %p1367_p2, %p1363_p13 }
 0x14d   : > { %v1049_v9 = vpop.trf.xlu0 }
 0x14e   : > { %1065 = vst [vmem:[%s328_s18] sm:$0xff] %v1049_v9 }
 0x155   : > { %v1050_v4 = vpop.trf.xlu0 }
 0x156   : > { %1066 = vst [vmem:[%s328_s18 + $0x8] sm:$0xff] %v1050_v4 }
 0x157   : > { %1371 = shalt.err (!%p1368_p3)
}
 0x158   : > { %s1408_s22 = smov 128   ;;  %s1409_s15 = smov 512  }
 0x159   : > { %s1410_s16 = smov 8  }
 0x15a   : > { %1301 = dma.vmem_to_hbm [thread:$0]  (%p1489_p5), %s1089_s19, 256, %s1091_s20, %s1073_s21, %s1408_s22, %s1409_s15, %s1410_s16  }
 0x15b PF: > { %p1307_p4 = scmp.ge.s32.totalorder %s1406_s27, 2  ;;  %s1113_s17 = sand.u32 1, %s1394_s24  }
 0x15c   : > { %s1114_s18 = scalar_lea.sflag [#allocation3], %s1113_s17 }
 0x15d   : > { %p1304_p7 = pnand %p1307_p4, %p1493_p6 }
 0x15f   : > { %p1305_p8 = pneg %p1304_p7 }
 0x161   : > { %1389 = dma.done.wait (%p1305_p8), %s1114_s18, 256  }
 0x162   : > { %1391 = vsyncadd (%p1305_p8), %s1114_s18, 4294967040  ;;  %p18_p9 = scmp.ge.s32.totalorder %s1476_s30, 6   ;;  %s1815_s24 = smov %s1398_s25 }
 0x163   : > { %s1816_s25 = smov %s1402_s26  ;;  %s1817_s26 = smov %s1487_s10 }
 0x164   : > { %s1818_s27 = smov %s1476_s30  ;;  %20 = sbr.rel (!%p18_p9) target bundleno = 3 (0x3), region = 100 }
 0x169   :  { %1120 = vsyncpa [#allocation3], 1 }
 0x16a   :  { %1122 = vsyncpa [#allocation3 + $0x1], 1 }

</bundles_post_ra>
